<compile_context>
chip_gen: v7x
topology: tpu7x:2x2x1
jax: 0.10.0
libtpu: 0.0.40
codegen_flags: <defaults>
</compile_context>

<pallas_src>
import functools

import jax
import jax.numpy as jnp
import numpy as np
from jax import lax
from jax.experimental import pallas as pl
from jax.experimental.pallas import tpu as pltpu


def _round_up(x: int, m: int) -> int:
    return ((x + m - 1) // m) * m


def _vmem_capacity_bytes() -> int:
    # Per-TensorCore VMEM capacity; fall back to the smallest (v7x: 64 MiB).
    try:
        return int(pltpu.get_tpu_info().vmem_capacity_bytes)
    except Exception:  # pragma: no cover - conservative fallback
        return 64 * 1024 * 1024


# ---------------------------------------------------------------------------
# Primary path: VMEM-resident table + chunked one-hot MXU gather.
# ---------------------------------------------------------------------------
def _onehot_gather_kernel(ids_ref, table_ref, out_ref, *, v_chunk, precision):
    """ids_ref: (TM, 1) int32; table_ref: (V, D) resident; out_ref: (TM, D)."""
    tm, d = out_ref.shape
    v = table_ref.shape[0]
    ids = ids_ref[...]                                          # (TM, 1)

    if v <= v_chunk:
        iota = lax.broadcasted_iota(jnp.int32, (tm, v), 1)      # (TM, V)
        one_hot = (ids == iota).astype(table_ref.dtype)
        out_ref[...] = jnp.dot(
            one_hot, table_ref[...],
            preferred_element_type=jnp.float32,
            precision=precision,
        ).astype(out_ref.dtype)
        return

    # Large vocab: bound the (TM, chunk) one-hot intermediate and accumulate.
    acc = jnp.zeros((tm, d), jnp.float32)
    for start in range(0, v, v_chunk):
        size = min(v_chunk, v - start)
        iota = start + lax.broadcasted_iota(jnp.int32, (tm, size), 1)
        one_hot = (ids == iota).astype(table_ref.dtype)
        acc = acc + jnp.dot(
            one_hot, table_ref[pl.ds(start, size), :],
            preferred_element_type=jnp.float32,
            precision=precision,
        )
    out_ref[...] = acc.astype(out_ref.dtype)


def _token_embedding_resident(flat_ids, table, B, S, tm, vmem_limit, v_chunk,
                              precision):
    V, D = table.shape
    n = flat_ids.shape[0]

    grid_n = pl.cdiv(n, tm)
    n_pad = grid_n * tm
    if n_pad != n:
        flat_ids = jnp.concatenate(
            [flat_ids, jnp.zeros((n_pad - n,), jnp.int32)])
    # NOTE: (tm, 1) id tiles are lane-sparse; a (1, tm) lane-dense layout with
    # an in-kernel XLU transpose is a possible micro-win (kept simple here).
    ids_2d = flat_ids.reshape(n_pad, 1)

    kernel = functools.partial(_onehot_gather_kernel,
                               v_chunk=v_chunk, precision=precision)
    out = pl.pallas_call(
        kernel,
        out_shape=jax.ShapeDtypeStruct((n_pad, D), table.dtype),
        grid_spec=pltpu.PrefetchScalarGridSpec(
            num_scalar_prefetch=0,
            grid=(grid_n,),
            in_specs=[
                # Per-step tile of token ids (sublane-aligned: tm % 8 == 0).
                pl.BlockSpec((tm, 1), lambda i: (i, 0)),
                # Whole table placed in VMEM once: no per-step DMA, no padding
                # copy, single-buffered (half the footprint of a blocked spec).
                pl.BlockSpec(memory_space=pltpu.MemorySpace.VMEM),
            ],
            # Lane-dense, sublane-aligned output slab written once per step.
            out_specs=pl.BlockSpec((tm, D), lambda i: (i, 0)),
        ),
        compiler_params=pltpu.CompilerParams(
            # Token tiles are independent -> v7x's 2 TCs may split the axis.
            dimension_semantics=("parallel",),
            vmem_limit_bytes=vmem_limit,
        ),
    )(ids_2d, table)

    return out[:n].reshape(B, S, D)


# ---------------------------------------------------------------------------
# Fallback path (table too big for VMEM): manual per-row DMA gather,
# TM rows per grid step, double-buffered across grid steps.
# ---------------------------------------------------------------------------
def _dma_gather_kernel(ids_ref, table_hbm, out_ref, buf, sem):
    """ids_ref: (n_pad,) int32 in SMEM; table_hbm: (V, D) in HBM;
    out_ref: (TM, D); buf: (2, TM, D) VMEM; sem: DMA sem (2,)."""
    tm, _ = out_ref.shape
    i = pl.program_id(0)
    n_steps = pl.num_programs(0)
    slot = lax.rem(i, 2)

    def fetch(step, slot_):
        base = step * tm

        @pl.loop(0, tm)
        def _(r):
            row = ids_ref[base + r]
            pltpu.make_async_copy(
                table_hbm.at[row], buf.at[slot_, r], sem.at[slot_]).start()

    # Prime this step's rows on the very first iteration.
    @pl.when(i == 0)
    def _():
        fetch(0, 0)

    # Prefetch next step's rows into the other slot (hides HBM gather latency).
    @pl.when(i + 1 < n_steps)
    def _():
        fetch(i + 1, 1 - slot)

    # Wait for this step's TM row copies.
    @pl.loop(0, tm)
    def _(r):
        pltpu.make_async_copy(
            table_hbm.at[0], buf.at[slot, 0], sem.at[slot]).wait()

    # One lane-dense (TM, D) store; pipeline writes it back while the next
    # step's gather DMAs are already in flight.
    out_ref[...] = buf[slot]


def _token_embedding_dma_gather(flat_ids, table, B, S, tm, vmem_limit):
    V, D = table.shape
    n = flat_ids.shape[0]
    grid_n = pl.cdiv(n, tm)
    n_pad = grid_n * tm
    if n_pad != n:
        flat_ids = jnp.concatenate(
            [flat_ids, jnp.zeros((n_pad - n,), jnp.int32)])

    out = pl.pallas_call(
        _dma_gather_kernel,
        out_shape=jax.ShapeDtypeStruct((n_pad, D), table.dtype),
        grid_spec=pltpu.PrefetchScalarGridSpec(
            num_scalar_prefetch=1,                # flat ids -> SMEM
            grid=(grid_n,),
            in_specs=[pl.BlockSpec(memory_space=pl.ANY)],   # table stays in HBM
            out_specs=pl.BlockSpec((tm, D), lambda i, ids: (i, 0)),
            scratch_shapes=[
                pltpu.VMEM((2, tm, D), table.dtype),        # double-buffered rows
                pltpu.SemaphoreType.DMA((2,)),
            ],
        ),
        compiler_params=pltpu.CompilerParams(
            dimension_semantics=("arbitrary",),   # cross-step prefetch => serial
            vmem_limit_bytes=vmem_limit,
        ),
    )(flat_ids, table)
    return out[:n].reshape(B, S, D)


# ---------------------------------------------------------------------------
# Public wrapper (== TokenEmbedding.forward)
# ---------------------------------------------------------------------------
def token_embedding(input_ids: jax.Array, table: jax.Array, *,
                    tm: int = 256,
                    v_chunk: int = 1024,
                    exact_f32: bool = False,
                    force_path: str | None = None) -> jax.Array:
    """Pallas equivalent of TokenEmbedding.forward.

    input_ids: [B, S] integer token ids
    table:     [V, D] embedding table (padding row pre-zeroed, as in
               nn.Embedding init) -- the forward pass is a pure row gather.
    returns:   [B, S, D]
    """
    B, S = input_ids.shape
    V, D = table.shape
    n = B * S

    # Clamp ids (PyTorch raises on OOB; here OOB reads the last valid row).
    flat_ids = jnp.clip(input_ids.reshape(n).astype(jnp.int32), 0, V - 1)

    # Tokens per grid step: multiple of 8 (f32 sublane), capped at `tm`.
    tm_eff = max(8, min(_round_up(tm, 8), _round_up(n, 8)))

    # Per-generation VMEM budgeting (v5e/v6e: 128 MiB, v7x: 64 MiB per TC).
    capacity = _vmem_capacity_bytes()
    budget = int(capacity * 0.70)        # gate for the resident-table path
    vmem_limit = int(capacity * 0.90)    # compile-time scoped-VMEM limit

    itemsize = jnp.dtype(table.dtype).itemsize
    d_pad = _round_up(D, 128)
    chunk = min(_round_up(V, 256), v_chunk)   # 256-aligned for v6e/v7x MXU
    est = (_round_up(V, 8) * d_pad * itemsize     # resident table, single copy
           + 2 * tm_eff * d_pad * itemsize        # double-buffered output tiles
           + 2 * tm_eff * 128 * 4                 # lane-padded (tm,1) id tiles
           + tm_eff * chunk * 4                   # one-hot chunk
           + 2 * tm_eff * d_pad * 4)              # f32 matmul result + accum
    est = int(est * 1.15)                         # headroom for compiler scratch

    if table.dtype == jnp.bfloat16:
        precision = jax.lax.Precision.DEFAULT     # exact: one-hot * bf16 row
    else:
        precision = (jax.lax.Precision.HIGHEST if exact_f32
                     else jax.lax.Precision.DEFAULT)

    use_resident = est <= budget
    if force_path == "resident":
        use_resident = True
    elif force_path == "gather":
        use_resident = False

    if use_resident:
        return _token_embedding_resident(flat_ids, table, B, S, tm_eff,
                                         vmem_limit, chunk, precision)
    return _token_embedding_dma_gather(flat_ids, table, B, S, tm_eff,
                                       vmem_limit)


def make_embedding_table(key, vocab_size: int, embedding_dim: int,
                         padding_idx: int = 0):
    # nn.Embedding default init: N(0,1), padding row zeroed.
    w = jax.random.normal(key, (vocab_size, embedding_dim), dtype=jnp.float32)
    w = w.at[padding_idx].set(0.0)
    return w


if __name__ == "__main__":
    key = jax.random.PRNGKey(0)
    k_tab, k_ids = jax.random.split(key)

    VOCAB = 32
    EMB_DIM = 128
    B, S = 2, 8
    PAD = 0

    table = make_embedding_table(k_tab, VOCAB, EMB_DIM, PAD)
    input_ids = jax.random.randint(k_ids, (B, S), 0, VOCAB, dtype=jnp.int32)
    input_ids = input_ids.at[0, :2].set(PAD)   # exercise the zeroed padding row

    # Reference: plain JAX gather (== nn.Embedding forward semantics).
    ref = jnp.take(table, input_ids, axis=0)

    # 1) Resident-table MXU path (default fast precision -> bf16-level rtol).
    out = token_embedding(input_ids, table)
    out = jax.block_until_ready(out)
    assert out.shape == (B, S, EMB_DIM)
    np.testing.assert_allclose(np.asarray(out), np.asarray(ref),
                               rtol=1e-2, atol=1e-5)
    assert float(jnp.abs(out[0, :2]).max()) <= 1e-6   # padding rows are zero

    # 2) Manual DMA-gather fallback (bit-exact row copies); small tm -> grid of
    #    2 steps so the cross-step prefetch double-buffering is exercised.
    out2 = token_embedding(input_ids, table, force_path="gather", tm=8)
    out2 = jax.block_until_ready(out2)
    np.testing.assert_array_equal(np.asarray(out2), np.asarray(ref))

    print("KERNEL_OK")
</pallas_src>

<mosaic_0001>
module attributes {stable_mosaic.version = 11 : i64} {
  func.func @_onehot_gather_kernel(%arg0: i32, %arg1: memref<16x1xi32, #tpu.memory_space<vmem>>, %arg2: memref<32x128xf32, #tpu.memory_space<vmem>>, %arg3: memref<16x128xf32, #tpu.memory_space<vmem>>) attributes {dimension_semantics = [#tpu.dimension_semantics<parallel>], iteration_bounds = array<i64: 1>, scalar_prefetch = 0 : i64, scratch_operands = 0 : i64, tpu.core_type = #tpu.core_type<tc>, window_params = [{transform_indices = @transform_0, window_bounds = array<i64: 16, 1>}, {pipeline_mode = #tpu.pipeline_mode<synchronous>, transform_indices = @transform_1, window_bounds = array<i64: 32, 128>}, {transform_indices = @transform_2, window_bounds = array<i64: 16, 128>}]} {
    %c0 = arith.constant 0 : index
    %c0_0 = arith.constant 0 : index
    %0 = vector.load %arg1[%c0, %c0_0] : memref<16x1xi32, #tpu.memory_space<vmem>>, vector<16x1xi32>
    %1 = tpu.iota {dimensions = array<i32: 1>} : vector<16x32xi32>
    %2 = vector.broadcast %0 : vector<16x1xi32> to vector<16x32xi32>
    %3 = arith.cmpi eq, %2, %1 : vector<16x32xi32>
    %4 = arith.extui %3 : vector<16x32xi1> to vector<16x32xi32>
    %5 = arith.sitofp %4 : vector<16x32xi32> to vector<16x32xf32>
    %c0_1 = arith.constant 0 : index
    %c0_2 = arith.constant 0 : index
    %6 = vector.load %arg2[%c0_1, %c0_2] : memref<32x128xf32, #tpu.memory_space<vmem>>, vector<32x128xf32>
    %cst = arith.constant dense<0.000000e+00> : vector<16x128xf32>
    %7 = tpu.matmul %5, %6, %cst {dimension_numbers = #tpu.dot_dimension_numbers<[1], [0], [0], [1], [0, 0, 1, 1], [], []>} : vector<16x32xf32>, vector<32x128xf32>, vector<16x128xf32> -> vector<16x128xf32>
    %c0_3 = arith.constant 0 : index
    %c0_4 = arith.constant 0 : index
    %8 = vector.load %arg3[%c0_3, %c0_4] : memref<16x128xf32, #tpu.memory_space<vmem>>, vector<16x128xf32>
    tpu.vector_store %arg3[%c0_3, %c0_4], %7 {strides = array<i32>} : memref<16x128xf32, #tpu.memory_space<vmem>>, vector<16x128xf32>,
    return
  }
  func.func @transform_0(%arg0: i32) -> (i32, i32) {
    %c0_i32 = arith.constant 0 : i32
    %c0_i32_0 = arith.constant 0 : i32
    return %arg0, %c0_i32 : i32, i32
  }
  func.func @transform_1(%arg0: i32) -> (i32, i32) {
    %c0_i32 = arith.constant 0 : i32
    %c0_i32_0 = arith.constant 0 : i32
    %c0_i32_1 = arith.constant 0 : i32
    return %c0_i32, %c0_i32_0 : i32, i32
  }
  func.func @transform_2(%arg0: i32) -> (i32, i32) {
    %c0_i32 = arith.constant 0 : i32
    %c0_i32_0 = arith.constant 0 : i32
    return %arg0, %c0_i32 : i32, i32
  }
}

</mosaic_0001>

<bundles_post_ra>
// kernel: tpu_custom_call.1
= control target key start
LH: loop header
LB: loop body
LE: loop exit
PB: predicated region body
PF: predicated region fallthrough
CT: control target
= control target key end

     0   :  { %7 = vsyncpa [#allocation3], 0  ;;  %s288_s0 = inlined_call_operand.vmem [shape: s32[16,1], index: 0, kind: input, shape index: {}]   ;;  %s289_s1 = inlined_call_operand.hbm [shape: f32[32,128], index: 1, kind: input, shape index: {}]   ;;  %s290_s2 = inlined_call_operand.hbm [shape: f32[16,128], index: 2, kind: output, shape index: {}]  }
   0x1   :  { %8 = vsyncpa [#allocation4], 0  ;;  %s231_s9 = smov [#allocation2]   ;;  %s183_s13 = scalar_lea.hbm %s289_s1, 512 }
   0x2   :  { %s16_s10 = sshll.u32 %s231_s9, 4  ;;  %p184_p0 = scmp.ne.s32.totalorder %s289_s1, %s183_s13  ;;  %s17_s10 = int_to_ptr.vmem [resolvable:$true] %s16_s10 }
   0x3   :  { %p187_p1 = scmp.lt.u32.totalorder %s183_s13, %s289_s1 }
   0x5   :  { %p189_p2 = pnand %p187_p1, %p184_p0 }
   0x7   :  { %192 = shalt.err (!%p189_p2)
}
   0x8   :  { %s193_s18 = scalar_lea.vmem %s17_s10, 512  ;;  %p198_p4 = scmp.lt.s32.totalorder %s17_s10, %s17_s10 }
   0x9   :  { %p194_p3 = scmp.ne.s32.totalorder %s17_s10, %s193_s18  ;;  %p199_p5 = scmp.lt.s32.totalorder %s193_s18, %s193_s18 }
   0xb   :  { %p200_p6 = por %p199_p5, %p198_p4 }
   0xd   :  { %p201_p7 = pnand %p200_p6, %p194_p3 }
   0xf   :  { %204 = shalt.err (!%p201_p7)
}
  0x10   :  { %s232_s19 = smov 128   ;;  %s233_s20 = smov 8  }
  0x11   :  { %22 = dma.hbm_to_vmem [thread:$0]  %s289_s1, 512, %s17_s10, [#allocation3], %s232_s19, %s232_s19, %s233_s20  }
  0x12   :  { %227 = dma.done.wait [#allocation3], 512  }
  0x13   :  { %228 = vsyncadd [#allocation3], 4294966784  ;;  %v234_v0 = vmov 0   ;;  %v26_v1 = vld [vmem:[%s288_s0] sm:$0xff]  ;;  %v43_v3 = vld [vmem:[#allocation2 + $0x8] sm:$0xff]  ;;  %v28_v9 = vlaneseq  ;;  %vm46_vm0 = vcmask 261120  }
  0x14   :  { %182 = vset.pattern.permute.xlu0 %v234_v0  ;;  %v42_v2 = vld [vmem:[#allocation2] sm:$0xff]  ;;  %v44_v4 = vld [vmem:[#allocation2 + $0x10] sm:$0xff]  ;;  %v45_v5 = vld [vmem:[#allocation2 + $0x18] sm:$0xff]  ;;  %v235_v12 = vmov 0.0  }
  0x15   :  { %31 = vperm.xlu0 %182, %v26_v1   ;;  %v27_v6 = vld [vmem:[%s288_s0 + $0x8] sm:$0xff]  ;;  %v168_v7 = vpack.c.bf16 %v43_v3, %v42_v2  ;;  %v172_v8 = vpack.c.bf16 %v45_v5, %v44_v4  ;;  %v29_v10 = vand.u32 127, %v28_v9  ;;  %s236_s0 = smov [#allocation5]  }
  0x16   :  { %s135_s1 = sshll.u32 %s236_s0, 4  ;;  %s136_s1 = int_to_ptr.vmem [resolvable:$true] %s135_s1 }
  0x17   :  { %169 = vmatprep.subr.bf16.mxu0 %v168_v7  ;;  %s205_s27 = scalar_lea.vmem %s136_s1, 256  ;;  %p210_p9 = scmp.lt.s32.totalorder %s136_s1, %s136_s1 }
  0x18   :  { %171 = vmatpush3.bf16.msra.mxu0 %v168_v7  ;;  %p206_p8 = scmp.ne.s32.totalorder %s136_s1, %s205_s27  ;;  %p211_p10 = scmp.lt.s32.totalorder %s205_s27, %s205_s27 }
  0x19   :  { %34 = vperm.xlu0 %182, %v27_v6   ;;  %173 = vmatprep.subr.bf16.mxu0 %v172_v8 }
  0x1a   :  { %p212_p11 = por %p211_p10, %p210_p9 }
  0x1c   :  { %175 = vmatpush3.bf16.msra.mxu0 %v172_v8  ;;  %p213_p12 = pnand %p212_p11, %p206_p8 }
  0x94   :  { %v32_v11 = vpop.permute.xlu0 %31 }
  0x95   :  { %vm36_vm1 = vcmp.eq.s32.totalorder %v32_v11, %v29_v10 }
  0x96   :  { %v147_v13 = vsel %vm36_vm1, 1.0, %v235_v12 }
  0x97   :  { %165 = vmatprep.mubr.msk.f32.mxu0 %vm46_vm0, %v147_v13 }
  0x98   :  { %v35_v14 = vpop.permute.xlu0 %34 }
  0x99   :  { %vm37_vm2 = vcmp.eq.s32.totalorder %v35_v14, %v29_v10 }
  0x9a   :  { %v148_v15 = vsel %vm37_vm2, 1.0, %v235_v12 }
  0x9b   :  { %166 = vmatmul.mubr.msk.f32.vlgmr.msra.gmra.mrb[0].mxu0 %vm46_vm0, %v148_v15 }
 0x16e   :  { %v167_v16 = vpop.f32.mrb[0].mxu0 }
 0x16f   :  { %129 = vst [vmem:[#allocation5 + $0x8] sm:$0xff] %v167_v16  ;;  %v119_v17 = vpop.f32.mrb[1].mxu0 }
 0x170   :  { %128 = vst [vmem:[#allocation5] sm:$0xff] %v119_v17 }
 0x171   :  { %216 = shalt.err (!%p213_p12)
}
 0x172   :  { %s217_s30 = scalar_lea.hbm %s290_s2, 256 }
 0x173   :  { %p218_p13 = scmp.ne.s32.totalorder %s290_s2, %s217_s30  ;;  %p221_p0 = scmp.lt.u32.totalorder %s217_s30, %s290_s2 }
 0x175   :  { %p223_p1 = pnand %p221_p0, %p218_p13 }
 0x177   :  { %226 = shalt.err (!%p223_p1)
}
 0x178   :  { %141 = dma.vmem_to_hbm [thread:$0]  %s136_s1, 256, %s290_s2, [#allocation4], %s232_s19, %s232_s19, %s233_s20  }
 0x179   :  { %229 = dma.done.wait [#allocation4], 256  }
 0x17a   :  { %230 = vsyncadd [#allocation4], 4294967040 }
 0x17b   :  { %145 = vsyncpa [#allocation3], 1 }
 0x17c   :  { %146 = vsyncpa [#allocation4], 1 }

</bundles_post_ra>
